<compile_context>
chip_gen: v7x
topology: tpu7x:2x2x1
jax: 0.10.0
libtpu: 0.0.40
codegen_flags: <defaults>
</compile_context>

<pallas_src>
import functools
import math

import jax
import jax.numpy as jnp
from jax.experimental import pallas as pl
from jax.experimental.pallas import tpu as pltpu

_KEEP_PROB = 0.7  # nn.Dropout(0.3)


def _doubleconv_kernel(x_ref, w1_ref, b1_ref, w2_ref, b2_ref, u_ref, o_ref,
                       *, training):
    """One batch image per grid step.

    x_ref : (1, H+4, W*Cin)      lane-folded input, 2 zero rows of padding each side
    w1_ref: (3, W*Cin,  W*Cout)  block-Toeplitz conv1 weights (one slab per dy tap)
    w2_ref: (3, W*Cout, W*Cout)  block-Toeplitz conv2 weights
    b*_ref: (1, W*Cout)          bias tiled along W
    u_ref : (1, H, W*Cout)       uniform(0,1) randoms for dropout
    o_ref : (1, H, W*Cout)       lane-dense output
    """
    _, hp4, _ = x_ref.shape
    H = hp4 - 4
    He = H + 2                        # conv1 rows incl. 1-row halo for conv2
    WC = o_ref.shape[-1]              # W * Cout

    x = x_ref[0]                      # (H+4, W*Cin)

    # ---- conv1 + bias + ReLU on H+2 rows (halo rows zeroed below) ----
    acc1 = jnp.zeros((He, WC), jnp.float32)
    for dy in range(3):
        acc1 = acc1 + jnp.dot(x[dy:dy + He, :], w1_ref[dy],
                              preferred_element_type=jnp.float32)
    a1 = jnp.maximum(acc1 + b1_ref[...], 0.0)            # (H+2, W*Cout)

    # Zero the halo rows: this IS the zero padding conv2 needs along H.
    # (Padding along W is already baked into the Toeplitz weights.)
    row = jax.lax.broadcasted_iota(jnp.int32, (He, 1), 0)
    h = a1 * jnp.logical_and(row >= 1, row <= H).astype(jnp.float32)

    # ---- conv2 + bias + ReLU ----
    acc2 = jnp.zeros((H, WC), jnp.float32)
    for dy in range(3):
        acc2 = acc2 + jnp.dot(h[dy:dy + H, :], w2_ref[dy],
                              preferred_element_type=jnp.float32)
    a2 = jnp.maximum(acc2 + b2_ref[...], 0.0)            # (H, W*Cout)

    # ---- dropout(p=0.3), training mode: keep w.p. 0.7, scale by 1/0.7 ----
    if training:
        keep = (u_ref[0] < _KEEP_PROB).astype(jnp.float32)
        a2 = a2 * keep * jnp.float32(1.0 / _KEEP_PROB)

    o_ref[...] = a2.reshape(1, H, WC)


def _block_toeplitz(w, width):
    """(3,3,Ci,Co) HWIO conv weights -> (3, W*Ci, W*Co) per-dy Toeplitz slabs.

    Slab[dy][xi*Ci+ci, xo*Co+co] = w[dy, dx, ci, co] with xi = xo + dx - 1;
    out-of-range xi are dropped (= SAME zero padding along W).
    """
    ci, co = w.shape[2], w.shape[3]
    shifts = jnp.stack([jnp.eye(width, k=1 - dx, dtype=jnp.float32)
                        for dx in range(3)])              # (3, W, W)
    t = jnp.einsum('dpq,ydio->ypiqo', shifts, w.astype(jnp.float32),
                   precision=jax.lax.Precision.HIGHEST)   # (3, W, Ci, W, Co)
    return t.reshape(3, width * ci, width * co)


def double_convolution(x_nchw, params, *, training=True, seed=0):
    """Forward pass of DobleConvolution. x_nchw: (N, Cin, H, W) float32."""
    w1, b1, w2, b2 = params
    N, Cin, H, W = x_nchw.shape
    Cout = w1.shape[-1]

    # NCHW -> NHWC, pad H by 2 zero rows each side, fold (W, C) onto lanes.
    x = jnp.transpose(x_nchw, (0, 2, 3, 1)).astype(jnp.float32)
    x = jnp.pad(x, ((0, 0), (2, 2), (0, 0), (0, 0)))
    x2d = x.reshape(N, H + 4, W * Cin)

    w1t = _block_toeplitz(w1, W)                          # (3, W*Cin,  W*Cout)
    w2t = _block_toeplitz(w2, W)                          # (3, W*Cout, W*Cout)
    b1row = jnp.tile(b1.reshape(1, Cout).astype(jnp.float32), (1, W))
    b2row = jnp.tile(b2.reshape(1, Cout).astype(jnp.float32), (1, W))

    # Dropout randoms generated host-side; sliced per grid tile by BlockSpec so
    # every tile gets a distinct mask.
    # TODO(synk): matches nn.Dropout(0.3) semantics, not PyTorch's exact RNG stream.
    if training:
        u = jax.random.uniform(jax.random.PRNGKey(seed), (N, H, W * Cout),
                               jnp.float32)
    else:
        u = jnp.zeros((N, H, W * Cout), jnp.float32)

    out2d = pl.pallas_call(
        functools.partial(_doubleconv_kernel, training=training),
        out_shape=jax.ShapeDtypeStruct((N, H, W * Cout), jnp.float32),
        grid_spec=pltpu.PrefetchScalarGridSpec(
            num_scalar_prefetch=0,
            grid=(N,),
            in_specs=[
                pl.BlockSpec((1, H + 4, W * Cin), lambda n: (n, 0, 0)),
                pl.BlockSpec((3, W * Cin, W * Cout), lambda n: (0, 0, 0)),   # resident
                pl.BlockSpec((1, W * Cout), lambda n: (0, 0)),               # resident
                pl.BlockSpec((3, W * Cout, W * Cout), lambda n: (0, 0, 0)),  # resident
                pl.BlockSpec((1, W * Cout), lambda n: (0, 0)),               # resident
                pl.BlockSpec((1, H, W * Cout), lambda n: (n, 0, 0)),
            ],
            out_specs=pl.BlockSpec((1, H, W * Cout), lambda n: (n, 0, 0)),
        ),
        compiler_params=pltpu.CompilerParams(
            dimension_semantics=("parallel",),
            vmem_limit_bytes=32 * 1024 * 1024,
        ),
    )(x2d, w1t, b1row, w2t, b2row, u)

    out = out2d.reshape(N, H, W, Cout)
    return jnp.transpose(out, (0, 3, 1, 2))               # back to NCHW


def init_params(key, in_channels, out_channels):
    k1, k2, k3, k4 = jax.random.split(key, 4)
    s1 = 1.0 / math.sqrt(in_channels * 9)
    s2 = 1.0 / math.sqrt(out_channels * 9)
    w1 = jax.random.normal(k1, (3, 3, in_channels, out_channels), jnp.float32) * s1
    b1 = jax.random.normal(k2, (1, out_channels), jnp.float32) * 0.01
    w2 = jax.random.normal(k3, (3, 3, out_channels, out_channels), jnp.float32) * s2
    b2 = jax.random.normal(k4, (1, out_channels), jnp.float32) * 0.01
    return w1, b1, w2, b2


def _reference_eval(x_nchw, params):
    """Pure-JAX reference (dropout disabled) for a correctness sanity check."""
    w1, b1, w2, b2 = params
    x = jnp.transpose(x_nchw, (0, 2, 3, 1))
    y = jax.lax.conv_general_dilated(
        x, w1, window_strides=(1, 1), padding="SAME",
        dimension_numbers=("NHWC", "HWIO", "NHWC"),
        precision=jax.lax.Precision.HIGHEST) + b1.reshape(1, 1, 1, -1)
    y = jnp.maximum(y, 0.0)
    y = jax.lax.conv_general_dilated(
        y, w2, window_strides=(1, 1), padding="SAME",
        dimension_numbers=("NHWC", "HWIO", "NHWC"),
        precision=jax.lax.Precision.HIGHEST) + b2.reshape(1, 1, 1, -1)
    y = jnp.maximum(y, 0.0)
    return jnp.transpose(y, (0, 3, 1, 2))


if __name__ == "__main__":
    N, Cin, Cout, H, W = 2, 4, 8, 16, 16
    key = jax.random.PRNGKey(0)
    kp, kx = jax.random.split(key)
    params = init_params(kp, Cin, Cout)
    x = jax.random.normal(kx, (N, Cin, H, W), jnp.float32)

    # Correctness: eval mode (dropout off) vs a pure-JAX conv reference.
    y_eval = double_convolution(x, params, training=False)
    y_ref = _reference_eval(x, params)
    jax.block_until_ready((y_eval, y_ref))
    assert y_eval.shape == (N, Cout, H, W)
    max_err = float(jnp.max(jnp.abs(y_eval - y_ref)))
    assert max_err < 1e-2, f"mismatch vs reference: {max_err}"

    # Training-mode forward (matches the nn.Module default .train() state).
    y_train = double_convolution(x, params, training=True, seed=1234)
    jax.block_until_ready(y_train)
    assert y_train.shape == (N, Cout, H, W)
    assert bool(jnp.all(jnp.isfinite(y_train)))

    print("KERNEL_OK")
</pallas_src>

<mosaic_0001>
module attributes {stable_mosaic.version = 11 : i64} {
  func.func @_doubleconv_kernel(%arg0: i32, %arg1: memref<1x20x64xf32, #tpu.memory_space<vmem>>, %arg2: memref<3x64x128xf32, #tpu.memory_space<vmem>>, %arg3: memref<1x128xf32, #tpu.memory_space<vmem>>, %arg4: memref<3x128x128xf32, #tpu.memory_space<vmem>>, %arg5: memref<1x128xf32, #tpu.memory_space<vmem>>, %arg6: memref<1x16x128xf32, #tpu.memory_space<vmem>>, %arg7: memref<1x16x128xf32, #tpu.memory_space<vmem>>) attributes {dimension_semantics = [#tpu.dimension_semantics<parallel>], iteration_bounds = array<i64: 2>, scalar_prefetch = 0 : i64, scratch_operands = 0 : i64, tpu.core_type = #tpu.core_type<tc>, window_params = [{transform_indices = @transform_0, window_bounds = array<i64: 1, 20, 64>}, {pipeline_mode = #tpu.pipeline_mode<synchronous>, transform_indices = @transform_1, window_bounds = array<i64: 3, 64, 128>}, {pipeline_mode = #tpu.pipeline_mode<synchronous>, transform_indices = @transform_2, window_bounds = array<i64: 1, 128>}, {pipeline_mode = #tpu.pipeline_mode<synchronous>, transform_indices = @transform_3, window_bounds = array<i64: 3, 128, 128>}, {pipeline_mode = #tpu.pipeline_mode<synchronous>, transform_indices = @transform_4, window_bounds = array<i64: 1, 128>}, {transform_indices = @transform_5, window_bounds = array<i64: 1, 16, 128>}, {transform_indices = @transform_6, window_bounds = array<i64: 1, 16, 128>}]} {
    %c0 = arith.constant 0 : index
    %c0_0 = arith.constant 0 : index
    %c0_1 = arith.constant 0 : index
    %0 = vector.load %arg1[%c0, %c0_0, %c0_1] : memref<1x20x64xf32, #tpu.memory_space<vmem>>, vector<1x20x64xf32>
    %1 = vector.shape_cast %0 : vector<1x20x64xf32> to vector<20x64xf32>
    %cst = arith.constant 0.000000e+00 : f32
    %2 = vector.broadcast %cst : f32 to vector<18x128xf32>
    %3 = vector.extract_strided_slice %1 {offsets = [0, 0], sizes = [18, 64], strides = [1, 1]} : vector<20x64xf32> to vector<18x64xf32>
    %c0_2 = arith.constant 0 : index
    %c0_3 = arith.constant 0 : index
    %c0_4 = arith.constant 0 : index
    %4 = vector.load %arg2[%c0_2, %c0_3, %c0_4] : memref<3x64x128xf32, #tpu.memory_space<vmem>>, vector<1x64x128xf32>
    %5 = vector.shape_cast %4 : vector<1x64x128xf32> to vector<64x128xf32>
    %cst_5 = arith.constant dense<0.000000e+00> : vector<18x128xf32>
    %6 = tpu.matmul %3, %5, %cst_5 {dimension_numbers = #tpu.dot_dimension_numbers<[1], [0], [0], [1], [0, 0, 1, 1], [], []>} : vector<18x64xf32>, vector<64x128xf32>, vector<18x128xf32> -> vector<18x128xf32>
    %7 = arith.addf %2, %6 : vector<18x128xf32>
    %8 = vector.extract_strided_slice %1 {offsets = [1, 0], sizes = [18, 64], strides = [1, 1]} : vector<20x64xf32> to vector<18x64xf32>
    %c1 = arith.constant 1 : index
    %c0_6 = arith.constant 0 : index
    %c0_7 = arith.constant 0 : index
    %9 = vector.load %arg2[%c1, %c0_6, %c0_7] : memref<3x64x128xf32, #tpu.memory_space<vmem>>, vector<1x64x128xf32>
    %10 = vector.shape_cast %9 : vector<1x64x128xf32> to vector<64x128xf32>
    %cst_8 = arith.constant dense<0.000000e+00> : vector<18x128xf32>
    %11 = tpu.matmul %8, %10, %cst_8 {dimension_numbers = #tpu.dot_dimension_numbers<[1], [0], [0], [1], [0, 0, 1, 1], [], []>} : vector<18x64xf32>, vector<64x128xf32>, vector<18x128xf32> -> vector<18x128xf32>
    %12 = arith.addf %7, %11 : vector<18x128xf32>
    %13 = vector.extract_strided_slice %1 {offsets = [2, 0], sizes = [18, 64], strides = [1, 1]} : vector<20x64xf32> to vector<18x64xf32>
    %c2 = arith.constant 2 : index
    %c0_9 = arith.constant 0 : index
    %c0_10 = arith.constant 0 : index
    %14 = vector.load %arg2[%c2, %c0_9, %c0_10] : memref<3x64x128xf32, #tpu.memory_space<vmem>>, vector<1x64x128xf32>
    %15 = vector.shape_cast %14 : vector<1x64x128xf32> to vector<64x128xf32>
    %cst_11 = arith.constant dense<0.000000e+00> : vector<18x128xf32>
    %16 = tpu.matmul %13, %15, %cst_11 {dimension_numbers = #tpu.dot_dimension_numbers<[1], [0], [0], [1], [0, 0, 1, 1], [], []>} : vector<18x64xf32>, vector<64x128xf32>, vector<18x128xf32> -> vector<18x128xf32>
    %17 = arith.addf %12, %16 : vector<18x128xf32>
    %c0_12 = arith.constant 0 : index
    %c0_13 = arith.constant 0 : index
    %18 = vector.load %arg3[%c0_12, %c0_13] : memref<1x128xf32, #tpu.memory_space<vmem>>, vector<1x128xf32>
    %19 = vector.broadcast %18 : vector<1x128xf32> to vector<18x128xf32>
    %20 = arith.addf %17, %19 : vector<18x128xf32>
    %cst_14 = arith.constant 0.000000e+00 : f32
    %21 = vector.broadcast %cst_14 : f32 to vector<18x128xf32>
    %22 = arith.maximumf %20, %21 : vector<18x128xf32>
    %23 = tpu.iota {dimensions = array<i32: 0>} : vector<18x1xi32>
    %c1_i32 = arith.constant 1 : i32
    %24 = vector.broadcast %c1_i32 : i32 to vector<18x1xi32>
    %25 = arith.cmpi sge, %23, %24 : vector<18x1xi32>
    %c16_i32 = arith.constant 16 : i32
    %26 = vector.broadcast %c16_i32 : i32 to vector<18x1xi32>
    %27 = arith.cmpi sle, %23, %26 : vector<18x1xi32>
    %28 = arith.andi %25, %27 : vector<18x1xi1>
    %29 = arith.extui %28 : vector<18x1xi1> to vector<18x1xi32>
    %30 = arith.sitofp %29 : vector<18x1xi32> to vector<18x1xf32>
    %31 = vector.broadcast %30 : vector<18x1xf32> to vector<18x128xf32>
    %32 = arith.mulf %22, %31 : vector<18x128xf32>
    %cst_15 = arith.constant 0.000000e+00 : f32
    %33 = vector.broadcast %cst_15 : f32 to vector<16x128xf32>
    %34 = vector.extract_strided_slice %32 {offsets = [0, 0], sizes = [16, 128], strides = [1, 1]} : vector<18x128xf32> to vector<16x128xf32>
    %c0_16 = arith.constant 0 : index
    %c0_17 = arith.constant 0 : index
    %c0_18 = arith.constant 0 : index
    %35 = vector.load %arg4[%c0_16, %c0_17, %c0_18] : memref<3x128x128xf32, #tpu.memory_space<vmem>>, vector<1x128x128xf32>
    %36 = vector.shape_cast %35 : vector<1x128x128xf32> to vector<128x128xf32>
    %cst_19 = arith.constant dense<0.000000e+00> : vector<16x128xf32>
    %37 = tpu.matmul %34, %36, %cst_19 {dimension_numbers = #tpu.dot_dimension_numbers<[1], [0], [0], [1], [0, 0, 1, 1], [], []>} : vector<16x128xf32>, vector<128x128xf32>, vector<16x128xf32> -> vector<16x128xf32>
    %38 = arith.addf %33, %37 : vector<16x128xf32>
    %39 = vector.extract_strided_slice %32 {offsets = [1, 0], sizes = [16, 128], strides = [1, 1]} : vector<18x128xf32> to vector<16x128xf32>
    %c1_20 = arith.constant 1 : index
    %c0_21 = arith.constant 0 : index
    %c0_22 = arith.constant 0 : index
    %40 = vector.load %arg4[%c1_20, %c0_21, %c0_22] : memref<3x128x128xf32, #tpu.memory_space<vmem>>, vector<1x128x128xf32>
    %41 = vector.shape_cast %40 : vector<1x128x128xf32> to vector<128x128xf32>
    %cst_23 = arith.constant dense<0.000000e+00> : vector<16x128xf32>
    %42 = tpu.matmul %39, %41, %cst_23 {dimension_numbers = #tpu.dot_dimension_numbers<[1], [0], [0], [1], [0, 0, 1, 1], [], []>} : vector<16x128xf32>, vector<128x128xf32>, vector<16x128xf32> -> vector<16x128xf32>
    %43 = arith.addf %38, %42 : vector<16x128xf32>
    %44 = vector.extract_strided_slice %32 {offsets = [2, 0], sizes = [16, 128], strides = [1, 1]} : vector<18x128xf32> to vector<16x128xf32>
    %c2_24 = arith.constant 2 : index
    %c0_25 = arith.constant 0 : index
    %c0_26 = arith.constant 0 : index
    %45 = vector.load %arg4[%c2_24, %c0_25, %c0_26] : memref<3x128x128xf32, #tpu.memory_space<vmem>>, vector<1x128x128xf32>
    %46 = vector.shape_cast %45 : vector<1x128x128xf32> to vector<128x128xf32>
    %cst_27 = arith.constant dense<0.000000e+00> : vector<16x128xf32>
    %47 = tpu.matmul %44, %46, %cst_27 {dimension_numbers = #tpu.dot_dimension_numbers<[1], [0], [0], [1], [0, 0, 1, 1], [], []>} : vector<16x128xf32>, vector<128x128xf32>, vector<16x128xf32> -> vector<16x128xf32>
    %48 = arith.addf %43, %47 : vector<16x128xf32>
    %c0_28 = arith.constant 0 : index
    %c0_29 = arith.constant 0 : index
    %49 = vector.load %arg5[%c0_28, %c0_29] : memref<1x128xf32, #tpu.memory_space<vmem>>, vector<1x128xf32>
    %50 = vector.broadcast %49 : vector<1x128xf32> to vector<16x128xf32>
    %51 = arith.addf %48, %50 : vector<16x128xf32>
    %cst_30 = arith.constant 0.000000e+00 : f32
    %52 = vector.broadcast %cst_30 : f32 to vector<16x128xf32>
    %53 = arith.maximumf %51, %52 : vector<16x128xf32>
    %54 = vector.shape_cast %53 : vector<16x128xf32> to vector<1x16x128xf32>
    %c0_31 = arith.constant 0 : index
    %c0_32 = arith.constant 0 : index
    %c0_33 = arith.constant 0 : index
    %55 = vector.load %arg7[%c0_31, %c0_32, %c0_33] : memref<1x16x128xf32, #tpu.memory_space<vmem>>, vector<1x16x128xf32>
    tpu.vector_store %arg7[%c0_31, %c0_32, %c0_33], %54 {strides = array<i32>} : memref<1x16x128xf32, #tpu.memory_space<vmem>>, vector<1x16x128xf32>,
    return
  }
  func.func @transform_0(%arg0: i32) -> (i32, i32, i32) {
    %c0_i32 = arith.constant 0 : i32
    %c0_i32_0 = arith.constant 0 : i32
    %c0_i32_1 = arith.constant 0 : i32
    return %arg0, %c0_i32, %c0_i32_0 : i32, i32, i32
  }
  func.func @transform_1(%arg0: i32) -> (i32, i32, i32) {
    %c0_i32 = arith.constant 0 : i32
    %c0_i32_0 = arith.constant 0 : i32
    %c0_i32_1 = arith.constant 0 : i32
    %c0_i32_2 = arith.constant 0 : i32
    return %c0_i32, %c0_i32_0, %c0_i32_1 : i32, i32, i32
  }
  func.func @transform_2(%arg0: i32) -> (i32, i32) {
    %c0_i32 = arith.constant 0 : i32
    %c0_i32_0 = arith.constant 0 : i32
    %c0_i32_1 = arith.constant 0 : i32
    return %c0_i32, %c0_i32_0 : i32, i32
  }
  func.func @transform_3(%arg0: i32) -> (i32, i32, i32) {
    %c0_i32 = arith.constant 0 : i32
    %c0_i32_0 = arith.constant 0 : i32
    %c0_i32_1 = arith.constant 0 : i32
    %c0_i32_2 = arith.constant 0 : i32
    return %c0_i32, %c0_i32_0, %c0_i32_1 : i32, i32, i32
  }
  func.func @transform_4(%arg0: i32) -> (i32, i32) {
    %c0_i32 = arith.constant 0 : i32
    %c0_i32_0 = arith.constant 0 : i32
    %c0_i32_1 = arith.constant 0 : i32
    return %c0_i32, %c0_i32_0 : i32, i32
  }
  func.func @transform_5(%arg0: i32) -> (i32, i32, i32) {
    %c0_i32 = arith.constant 0 : i32
    %c0_i32_0 = arith.constant 0 : i32
    %c0_i32_1 = arith.constant 0 : i32
    return %arg0, %c0_i32, %c0_i32_0 : i32, i32, i32
  }
  func.func @transform_6(%arg0: i32) -> (i32, i32, i32) {
    %c0_i32 = arith.constant 0 : i32
    %c0_i32_0 = arith.constant 0 : i32
    %c0_i32_1 = arith.constant 0 : i32
    return %arg0, %c0_i32, %c0_i32_0 : i32, i32, i32
  }
}

</mosaic_0001>

<bundles_post_ra>
// kernel: tpu_custom_call.1
= control target key start
LH: loop header
LB: loop body
LE: loop exit
PB: predicated region body
PF: predicated region fallthrough
CT: control target
= control target key end

     0   :  { %11 = vsyncpa [#allocation3], 0  ;;  %s1971_s0 = inlined_call_operand.vmem [shape: f32[2,20,64], index: 0, kind: input, shape index: {}]   ;;  %s1972_s1 = inlined_call_operand.hbm [shape: f32[3,64,128], index: 1, kind: input, shape index: {}]   ;;  %s1973_s2 = inlined_call_operand.vmem [shape: f32[1,128], index: 2, kind: input, shape index: {}]   ;;  %s1974_s3 = inlined_call_operand.hbm [shape: f32[3,128,128], index: 3, kind: input, shape index: {}]   ;;  %s1975_s4 = inlined_call_operand.vmem [shape: f32[1,128], index: 4, kind: input, shape index: {}]   ;;  %s1976_s5 = inlined_call_operand.vmem [shape: f32[2,16,128], index: 5, kind: input, shape index: {}]   ;;  %s1977_s6 = inlined_call_operand.hbm [shape: f32[2,16,128], index: 6, kind: output, shape index: {}]  }
   0x1   :  { %12 = vsyncpa [#allocation6], 0 }
   0x2   :  { %13 = vsyncpa [#allocation4], 0 }
   0x3   :  { %15 = vsyncpa [#allocation4 + $0x1], 0  ;;  %s1731_s21 = smov 0   ;;  %s1733_s22 = smov 0  }
   0x4   :  { %s1735_s23 = smov 0   ;;  %s1737_s24 = smov 0  }
   0x5 LB: > { %s1752_s5 = sadd.s32 4294967295, %s1684_s24   ;;  %s1058_s25 = sadd.s32 4294967294, %s1684_s24   ;;  %s1684_s24 = sphi %s1737_s24, %s1995_s24   ;;  %s1680_s23 = sphi %s1735_s23, %s1994_s23   ;;  %s1676_s22 = sphi %s1733_s22, %s1993_s22   ;;  %s1672_s21 = sphi %s1731_s21, %s1992_s21  }
   0x6   : > { %s1756_s26 = sadd.s32 1, %s1684_s24   ;;  %s164_s27 = sadd.s32 1, %s1680_s23 }
   0x7   : > { %s161_s28 = ssub.s32 %s1684_s24, %s1756_s26  ;;  %p174_p0 = scmp.ne.s32.totalorder %s1680_s23, %s1676_s22 }
   0x8   : > { %p162_p1 = scmp.eq.s32.totalorder %s161_s28, 0  ;;  %p175_p2 = scmp.eq.s32.totalorder %s1752_s5, 1 }
   0x9   : > { %p180_p3 = scmp.ne.s32.totalorder %s1676_s22, %s1672_s21  ;;  %p181_p4 = scmp.eq.s32.totalorder %s1058_s25, 1 }
   0xa   : > { %s1767_s29 = scalar_select %p162_p1, %s1680_s23, %s164_s27  }
   0xb   : > { %p1769_p5 = por %p175_p2, %p174_p0  ;;  %p1773_p6 = por %p181_p4, %p180_p3 }
   0xc   : > { %p1059_p7 = scmp.ge.s32.totalorder %s1684_s24, 1  ;;  %p188_p8 = scmp.lt.s32.totalorder %s1684_s24, 3 }
   0xd   : > { %s1981_s30 = scalar_select %p1769_p5, 1, 0 }
   0xe   : > { %s1982_s7 = scalar_select %p1773_p6, 1, 0 }
   0xf   : > { %p1978_p9 = scmp.eq.s32.totalorder %s1752_s5, 0  ;;  %p1780_p10 = pnand %p1059_p7, %p188_p8 }
  0x10   : > { %s1686_s9 = smov [#allocation2]   ;;  %s1687_s12 = smov [#allocation5]  }
  0x11   : > { %s1983_s8 = scalar_select %p1780_p10, 1, 0 }
  0x12   : > { %s200_s10 = sshll.u32 %s1686_s9, 4  ;;  %p1501_p11 = pneg %p1780_p10  ;;  %s201_s10 = int_to_ptr.vmem [resolvable:$true] %s200_s10 }
  0x13   : > { %s216_s13 = sshll.u32 %s1687_s12, 4  ;;  %s1558_s16 = scalar_lea.hbm %s1972_s1, 3072  ;;  %s1792_s13 = int_to_ptr.vmem [resolvable:$true] %s216_s13 }
  0x14   : > { %p1788_p12 = pnand %p1978_p9, %p1501_p11  ;;  %p1559_p13 = scmp.ne.s32.totalorder %s1972_s1, %s1558_s16 }
  0x15   : > { %p1565_p3 = scmp.lt.u32.totalorder %s1558_s16, %s1972_s1 }
  0x16   : > { %p1560_p0 = pneg %p1788_p12 }
  0x18   : > { %p1561_p1 = pnand %p1560_p0, %p1559_p13 }
  0x1a   : > { %p1562_p2 = pneg %p1561_p1 }
  0x1c   : > { %p1567_p4 = pnand %p1565_p3, %p1562_p2 }
  0x1e   : > { %1570 = shalt.err (!%p1567_p4)
}
  0x1f   : > { %s1571_s25 = scalar_lea.vmem %s201_s10, 3072  ;;  %p1579_p9 = scmp.lt.s32.totalorder %s201_s10, %s201_s10 }
  0x20   : > { %p1572_p7 = scmp.ne.s32.totalorder %s201_s10, %s1571_s25  ;;  %p1580_p6 = scmp.lt.s32.totalorder %s1571_s25, %s1571_s25 }
  0x22   : > { %p1574_p8 = pnand %p1572_p7, %p1560_p0  ;;  %p1581_p5 = por %p1580_p6, %p1579_p9 }
  0x24   : > { %p1575_p11 = pneg %p1574_p8 }
  0x26   : > { %p1582_p10 = pnand %p1581_p5, %p1575_p11 }
  0x28   : > { %1585 = shalt.err (!%p1582_p10)
}
  0x29   : > { %s1688_s27 = smov 128   ;;  %s1689_s28 = smov 8  }
  0x2a   : > { %1504 = dma.hbm_to_vmem [thread:$0]  (!%p1788_p12), %s1972_s1, 3072, %s201_s10, [#allocation3], %s1688_s27, %s1688_s27, %s1689_s28  }
  0x2b   : > { %s1586_s16 = scalar_lea.hbm %s1974_s3, 6144 }
  0x2c   : > { %p1587_p13 = scmp.ne.s32.totalorder %s1974_s3, %s1586_s16  ;;  %p1593_p9 = scmp.lt.u32.totalorder %s1586_s16, %s1974_s3 }
  0x2e   : > { %p1589_p5 = pnand %p1587_p13, %p1560_p0 }
  0x30   : > { %p1590_p6 = pneg %p1589_p5 }
  0x32   : > { %p1595_p10 = pnand %p1593_p9, %p1590_p6 }
  0x34   : > { %1598 = shalt.err (!%p1595_p10)
}
  0x35   : > { %s1599_s10 = scalar_lea.vmem %s1792_s13, 6144  ;;  %p1607_p4 = scmp.lt.s32.totalorder %s1792_s13, %s1792_s13 }
  0x36   : > { %p1600_p1 = scmp.ne.s32.totalorder %s1792_s13, %s1599_s10  ;;  %p1608_p7 = scmp.lt.s32.totalorder %s1599_s10, %s1599_s10 }
  0x38   : > { %p1602_p2 = pnand %p1600_p1, %p1560_p0  ;;  %p1609_p8 = por %p1608_p7, %p1607_p4 }
  0x3a   : > { %p1603_p3 = pneg %p1602_p2 }
  0x3c   : > { %p1610_p11 = pnand %p1609_p8, %p1603_p3 }
  0x3e   : > { %1613 = shalt.err (!%p1610_p11)
}
  0x3f   : > { %1507 = dma.hbm_to_vmem [thread:$0]  (!%p1788_p12), %s1974_s3, 6144, %s1792_s13, [#allocation6], %s1688_s27, %s1688_s27, %s1689_s28  }
  0x40   : > { %p1985_p13 = scmp.ne.s32.totalorder %s1983_s8, 0 }
  0x41   : > { %p1986_p5 = scmp.eq.s32.totalorder (!%p1985_p13), %s1752_s5, 0 }
  0x42   : > { %251 = sbr.rel (%p1985_p13) target bundleno = 601 (0x259), region = 44 }
  0x49   : > { %1659 = dma.done.wait (%p1986_p5), [#allocation3], 3072   ;;  %p1987_p0 = pmov %p1986_p5 }
  0x4b   : > { %1661 = vsyncadd (%p1987_p0), [#allocation3], 4294964224  ;;  %p1988_p6 = pmov %p1987_p0 }
  0x4c   : > { %p1989_p9 = pmov %p1987_p0 }
  0x4d   : > { %1663 = dma.done.wait (%p1988_p6), [#allocation6], 6144  }
  0x4e   : > { %1665 = vsyncadd (%p1989_p9), [#allocation6], 4294961152  ;;  %p290_p10 = scmp.lt.s32.totalorder %s1752_s5, 1  ;;  %v1690_v0 = vmov 0.0|0.0   ;;  %vm1691_vm0 = vmmov 0   ;;  %v1692_v1 = vmov 0.0  }
  0x4f   : > { %1354 = vmatprep.subr.bf16.mxu0 %v1690_v0  ;;  %1366 = vmatprep.subr.bf16.mxu1 %v1690_v0  ;;  %v312_v2 = vld [vmem:[#allocation2 + $0x40] sm:$0xff]  ;;  %v313_v3 = vld [vmem:[#allocation2 + $0x48] sm:$0xff]  ;;  %v314_v7 = vld [vmem:[#allocation2 + $0x50] sm:$0xff]  ;;  %vm323_vm1 = vcmask 1046528   ;;  %vm329_vm2 = vcmask 523264   ;;  %vm511_vm3 = vcmask 1045504  }
  0x50   : > { %1190 = vmatprep.mubr.msk.f32.mxu0 %vm1691_vm0, %v1692_v1  ;;  %1215 = vmatprep.mubr.msk.f32.mxu1 %vm1691_vm0, %v1692_v1  ;;  %s291_s8 = scalar_select %p290_p10, %s1752_s5, 1  ;;  %v303_v4 = vld [vmem:[#allocation2] sm:$0xff]  ;;  %v1355_v5 = vpack.c.bf16 %v313_v3, %v312_v2  ;;  %v304_v6 = vld [vmem:[#allocation2 + $0x8] sm:$0xff]  ;;  %v315_v8 = vld [vmem:[#allocation2 + $0x58] sm:$0xff] }
  0x51   : > { %v1367_v9 = vpack.c.bf16 %v304_v6, %v303_v4  ;;  %v305_v10 = vld [vmem:[#allocation2 + $0x10] sm:$0xff]  ;;  %v306_v11 = vld [vmem:[#allocation2 + $0x18] sm:$0xff]  ;;  %v1358_v12 = vpack.c.bf16 %v315_v8, %v314_v7  ;;  %v316_v14 = vld [vmem:[#allocation2 + $0x60] sm:$0xff]  ;;  %s287_s15 = sand.u32 1, %s1676_s22   ;;  %s1086_s10 = sshll.u32 %s1752_s5, 8 }
  0x52   : > { %s1490_s11 = smul.u32 24, %s291_s8  ;;  %1356 = vmatpush3.bf16.msra.mxu0 %v1355_v5  ;;  %v1370_v13 = vpack.c.bf16 %v306_v11, %v305_v10  ;;  %v317_v15 = vld [vmem:[#allocation2 + $0x68] sm:$0xff]  ;;  %v307_v16 = vld [vmem:[#allocation2 + $0x20] sm:$0xff]  ;;  %v318_v19 = vld [vmem:[#allocation2 + $0x70] sm:$0xff]  ;;  %s1066_s16 = sshll.u32 %s287_s15, 4 }
  0x53   : > { %1368 = vmatpush3.bf16.msra.mxu1 %v1367_v9  ;;  %1357 = vmatprep.subr.bf16.mxu0 %v1690_v0  ;;  %v308_v17 = vld [vmem:[#allocation2 + $0x28] sm:$0xff]  ;;  %v1361_v18 = vpack.c.bf16 %v317_v15, %v316_v14  ;;  %v319_v21 = vld [vmem:[#allocation2 + $0x78] sm:$0xff]  ;;  %v309_v24 = vld [vmem:[#allocation2 + $0x30] sm:$0xff]  ;;  %s289_s19 = scalar_lea.vmem [#allocation7], %s1066_s16  ;;  %s1928_s8 = scalar_lea.hbm %s1977_s6, %s1086_s10 }
  0x54   : > { %1369 = vmatprep.subr.bf16.mxu1 %v1690_v0  ;;  %s294_s28 = scalar_lea.vmem %s1971_s0, %s1490_s11  ;;  %v1373_v20 = vpack.c.bf16 %v308_v17, %v307_v16  ;;  %v310_v25 = vld [vmem:[#allocation2 + $0x38] sm:$0xff]  ;;  %v641_v26 = vld [vmem:[#allocation5] sm:$0xff]  ;;  %v642_v27 = vld [vmem:[#allocation5 + $0x8] sm:$0xff]  ;;  %v1364_v28 = vpack.c.bf16 %v319_v21, %v318_v19  ;;  %s962_s20 = sshll.u32 %s289_s19, 4  ;;  %s1923_s20 = int_to_ptr.vmem [resolvable:$true] %s962_s20 }
  0x55   : > { %v1865_v22 = vld [vmem:[%s294_s28] sm:$0xff]  ;;  %v1867_v23 = vld [vmem:[%s294_s28 + $0x8] sm:$0xff]  ;;  %v1376_v31 = vpack.c.bf16 %v310_v25, %v309_v24  ;;  %v302_v34 = vld [vmem:[%s294_s28 + $0x10] sm:$0xf]  ;;  %v1422_v35 = vpack.c.bf16 %v642_v27, %v641_v26  ;;  %s1930_s11 = scalar_lea.sflag [#allocation4], %s287_s15  ;;  %s1614_s13 = scalar_lea.vmem %s1923_s20, 256 }
  0x56   : > { %1359 = vmatpush3.bf16.msra.mxu0 %v1358_v12  ;;  %v324_v29 = vrot.slane %v1865_v22, 1  ;;  %v325_v30 = vrot.slane %v1867_v23, 1  ;;  %v503_v32 = vld [vmem:[#allocation2 + $0x80] sm:$0xff]  ;;  %v504_v33 = vld [vmem:[#allocation2 + $0x88] sm:$0xff]  ;;  %v327_v38 = vrot.slane %v302_v34, 1  ;;  %v643_v39 = vld [vmem:[#allocation5 + $0x10] sm:$0xff]  ;;  %p1615_p12 = scmp.ne.s32.totalorder %s1923_s20, %s1614_s13 }
  0x57   : > { %1371 = vmatpush3.bf16.msra.mxu1 %v1370_v13  ;;  %1360 = vmatprep.subr.bf16.mxu0 %v1690_v0  ;;  %v1379_v37 = vpack.c.bf16 %v504_v33, %v503_v32  ;;  %v644_v40 = vld [vmem:[#allocation5 + $0x18] sm:$0xff]  ;;  %v505_v41 = vld [vmem:[#allocation2 + $0x90] sm:$0xff]  ;;  %v507_v46 = vld [vmem:[#allocation2 + $0xa0] sm:$0xff]  ;;  %v512_v51 = vrot.slane %v1865_v22, 2  ;;  %v513_v52 = vrot.slane %v1867_v23, 2  ;;  %v515_v55 = vrot.slane %v302_v34, 2 }
  0x58   : > { %1372 = vmatprep.subr.bf16.mxu1 %v1690_v0  ;;  %v326_v36 = vsel %vm323_vm1, %v324_v29, %v325_v30  ;;  %v506_v42 = vld [vmem:[#allocation2 + $0x98] sm:$0xff]  ;;  %v1426_v43 = vpack.c.bf16 %v644_v40, %v643_v39  ;;  %v328_v45 = vsel %vm323_vm1, %v325_v30, %v327_v38  ;;  %v508_v47 = vld [vmem:[#allocation2 + $0xa8] sm:$0xff]  ;;  %v509_v49 = vld [vmem:[#allocation2 + $0xb0] sm:$0xff]  ;;  %p1990_p1 = scmp.ne.s32.totalorder %s1981_s30, 0  ;;  %s1693_s5 = smov [#allocation7]  }
  0x59   : > { %v1382_v44 = vpack.c.bf16 %v506_v42, %v505_v41  ;;  %v1385_v48 = vpack.c.bf16 %v508_v47, %v507_v46  ;;  %v510_v50 = vld [vmem:[#allocation2 + $0xb8] sm:$0xff]  ;;  %v514_v54 = vsel %vm511_vm3, %v512_v51, %v513_v52  ;;  %v516_v56 = vsel %vm511_vm3, %v513_v52, %v515_v55  ;;  %v645_v57 = vld [vmem:[#allocation5 + $0x20] sm:$0xff]  ;;  %v646_v58 = vld [vmem:[#allocation5 + $0x28] sm:$0xff]  ;;  %s1618_s27 = sshll.u32 %s1693_s5, 4  ;;  %s1619_s27 = int_to_ptr.vmem [resolvable:$false] %s1618_s27 }
  0x5a   : > { %1362 = vmatpush3.bf16.msra.mxu0 %v1361_v18  ;;  %v1388_v53 = vpack.c.bf16 %v510_v50, %v509_v49  ;;  %v1430_v59 = vpack.c.bf16 %v646_v58, %v645_v57  ;;  %v658_v60 = vld [vmem:[#allocation5 + $0x80] sm:$0xff]  ;;  %v659_v61 = vld [vmem:[#allocation5 + $0x88] sm:$0xff]  ;;  %v647_v63 = vld [vmem:[#allocation5 + $0x30] sm:$0xff]  ;;  %v619_v52 = vlaneseq  ;;  %p1616_p2 = pnand %p1615_p12, %p1990_p1  ;;  %s1620_s28 = scalar_lea.vmem %s1619_s27, 512 }
  0x5b   : > { %1374 = vmatpush3.bf16.msra.mxu1 %v1373_v20  ;;  %1363 = vmatprep.subr.bf16.mxu0 %v1690_v0  ;;  %v1390_v62 = vpack.c.bf16 %v659_v61, %v658_v60  ;;  %v660_v3 = vld [vmem:[#allocation5 + $0x90] sm:$0xff]  ;;  %v661_v4 = vld [vmem:[#allocation5 + $0x98] sm:$0xff]  ;;  %v649_v6 = vld [vmem:[#allocation5 + $0x40] sm:$0xff]  ;;  %p1621_p4 = scmp.lt.s32.totalorder %s1923_s20, %s1619_s27  ;;  %p1622_p7 = scmp.lt.s32.totalorder %s1620_s28, %s1614_s13 }
  0x5c   : > { %1375 = vmatprep.subr.bf16.mxu1 %v1690_v0  ;;  %v1394_v5 = vpack.c.bf16 %v661_v4, %v660_v3  ;;  %v650_v7 = vld [vmem:[#allocation5 + $0x48] sm:$0xff]  ;;  %v662_v9 = vld [vmem:[#allocation5 + $0xa0] sm:$0xff]  ;;  %v651_v12 = vld [vmem:[#allocation5 + $0x50] sm:$0xff]  ;;  %p1617_p3 = pneg %p1616_p2 }
  0x5d   : > { %v1438_v8 = vpack.c.bf16 %v650_v7, %v649_v6  ;;  %v663_v10 = vld [vmem:[#allocation5 + $0xa8] sm:$0xff]  ;;  %v652_v13 = vld [vmem:[#allocation5 + $0x58] sm:$0xff]  ;;  %v664_v15 = vld [vmem:[#allocation5 + $0xb0] sm:$0xff]  ;;  %p1623_p8 = por %p1622_p7, %p1621_p4 }
  0x5e   : > { %1365 = vmatpush3.bf16.msra.mxu0 %v1364_v28  ;;  %v1398_v11 = vpack.c.bf16 %v663_v10, %v662_v9  ;;  %v1442_v14 = vpack.c.bf16 %v652_v13, %v651_v12  ;;  %v665_v16 = vld [vmem:[#allocation5 + $0xb8] sm:$0xff]  ;;  %v653_v18 = vld [vmem:[#allocation5 + $0x60] sm:$0xff]  ;;  %v654_v19 = vld [vmem:[#allocation5 + $0x68] sm:$0xff] }
  0x5f   : > { %1377 = vmatpush3.bf16.msra.mxu1 %v1376_v31  ;;  %1378 = vmatprep.subr.bf16.mxu0 %v1690_v0  ;;  %v1402_v17 = vpack.c.bf16 %v665_v16, %v664_v15  ;;  %v1446_v20 = vpack.c.bf16 %v654_v19, %v653_v18  ;;  %v666_v21 = vld [vmem:[#allocation5 + $0xc0] sm:$0xff]  ;;  %v655_v24 = vld [vmem:[#allocation5 + $0x70] sm:$0xff]  ;;  %v656_v25 = vld [vmem:[#allocation5 + $0x78] sm:$0xff]  ;;  %p1624_p11 = pnand %p1623_p8, %p1617_p3 }
  0x60   : > { %1423 = vmatprep.subr.bf16.mxu1 %v1422_v35  ;;  %v1450_v26 = vpack.c.bf16 %v656_v25, %v655_v24  ;;  %v668_v27 = vld [vmem:[#allocation5 + $0xd0] sm:$0xff]  ;;  %v669_v28 = vld [vmem:[#allocation5 + $0xd8] sm:$0xff]  ;;  %v835_v30 = vld [vmem:[#allocation5 + $0x100] sm:$0xff] }
  0x61   : > { %1191 = vmatmul.mubr.msk.f32.vlgmr.msra.gmra.mrb[0].mxu0 %vm329_vm2, %v326_v36  ;;  %v1410_v29 = vpack.c.bf16 %v669_v28, %v668_v27  ;;  %v836_v31 = vld [vmem:[#allocation5 + $0x108] sm:$0xff]  ;;  %v670_v33 = vld [vmem:[#allocation5 + $0xe0] sm:$0xff]  ;;  %v672_v36 = vld [vmem:[#allocation5 + $0xf0] sm:$0xff] }
  0x62   : > { %1216 = vmatmul.mubr.msk.f32.vlgmr.msra.gmra.mrb[0].mxu1 %vm329_vm2, %v1865_v22  ;;  %1380 = vmatpush3.bf16.msra.mxu0 %v1379_v37  ;;  %v667_v22 = vld [vmem:[#allocation5 + $0xc8] sm:$0xff]  ;;  %v1454_v32 = vpack.c.bf16 %v836_v31, %v835_v30  ;;  %v673_v37 = vld [vmem:[#allocation5 + $0xf8] sm:$0xff]  ;;  %v1077_v57 = vld [vmem:[%s1973_s2] ss:$0 sm:$0xff] }
  0x63   : > { %1381 = vmatprep.subr.bf16.mxu0 %v1690_v0  ;;  %1193 = vmatprep.mubr.msk.f32.mxu0 %vm1691_vm0, %v1692_v1  ;;  %v837_v4 = vld [vmem:[#allocation5 + $0x110] sm:$0xff]  ;;  %v840_v15 = vld [vmem:[#allocation5 + $0x128] sm:$0xff]  ;;  %v843_v31 = vld [vmem:[#allocation5 + $0x140] sm:$0xff] }
  0x64   : > { %1218 = vmatprep.mubr.msk.f32.mxu1 %vm1691_vm0, %v1692_v1  ;;  %1425 = vmatpush3.bf16.msra.mxu1 %v1422_v35  ;;  %v841_v25 = vld [vmem:[#allocation5 + $0x130] sm:$0xff] }
  0x65   : > { %1194 = vmatmul.mubr.msk.f32.gmra.mrb[2].mxu0 %vm329_vm2, %v328_v45  ;;  %1427 = vmatprep.subr.bf16.mxu1 %v1426_v43 }
  0x66   : > { %1383 = vmatpush3.bf16.msra.mxu0 %v1382_v44  ;;  %1219 = vmatmul.mubr.msk.f32.gmra.mrb[2].mxu1 %vm329_vm2, %v1867_v23  ;;  %v1406_v23 = vpack.c.bf16 %v667_v22, %v666_v21 }
  0x67   : > { %1384 = vmatprep.subr.bf16.mxu0 %v1690_v0  ;;  %1196 = vmatprep.mubr.msk.f32.mxu0 %vm1691_vm0, %v1692_v1 }
  0x68   : > { %1221 = vmatprep.mubr.msk.f32.mxu1 %vm1691_vm0, %v1692_v1  ;;  %1429 = vmatpush3.bf16.msra.mxu1 %v1426_v43 }
  0x69   : > { %1197 = vmatmul.mubr.msk.f32.gmra.mrb[4].mxu0 %vm329_vm2, %v327_v38  ;;  %1431 = vmatprep.subr.bf16.mxu1 %v1430_v59  ;;  %v1418_v38 = vpack.c.bf16 %v673_v37, %v672_v36  ;;  %v846_v36 = vld [vmem:[#allocation5 + $0x158] sm:$0xff] }
  0x6a   : > { %1386 = vmatpush3.bf16.msra.mxu0 %v1385_v48  ;;  %1222 = vmatmul.mubr.msk.f32.gmra.mrb[4].mxu1 %vm329_vm2, %v302_v34  ;;  %v671_v34 = vld [vmem:[#allocation5 + $0xe8] sm:$0xff] }
  0x6b   : > { %1387 = vmatprep.subr.bf16.mxu0 %v1690_v0  ;;  %1240 = vmatprep.mubr.msk.f32.mxu0 %vm1691_vm0, %v1692_v1  ;;  %v648_v0 = vld [vmem:[#allocation5 + $0x38] sm:$0xff]  ;;  %v1414_v35 = vpack.c.bf16 %v671_v34, %v670_v33 }
  0x6c   : > { %1433 = vmatpush3.bf16.msra.mxu1 %v1430_v59  ;;  %v1434_v2 = vpack.c.bf16 %v648_v0, %v647_v63 }
  0x6e   : > { %1389 = vmatpush3.bf16.msra.mxu0 %v1388_v53  ;;  %1435 = vmatprep.subr.bf16.mxu1 %v1434_v2 }
  0x6f   : > { %1391 = vmatprep.subr.bf16.mxu0 %v1390_v62 }
  0x70   : > { %1437 = vmatpush3.bf16.msra.mxu1 %v1434_v2 }
  0x71   : > { %1241 = vmatmul.mubr.msk.f32.vlgmr.msra.gmra.mrb[6].mxu0 %vm329_vm2, %v514_v54  ;;  %1439 = vmatprep.subr.bf16.mxu1 %v1438_v8 }
  0x72   : > { %1243 = vmatprep.mubr.msk.f32.mxu0 %vm1691_vm0, %v1692_v1  ;;  %1393 = vmatpush3.bf16.msra.mxu0 %v1390_v62 }
  0x73   : > { %1395 = vmatprep.subr.bf16.mxu0 %v1394_v5 }
  0x74   : > { %1441 = vmatpush3.bf16.msra.mxu1 %v1438_v8 }
  0x75   : > { %1244 = vmatmul.mubr.msk.f32.gmra.mrb[8].mxu0 %vm329_vm2, %v516_v56  ;;  %1443 = vmatprep.subr.bf16.mxu1 %v1442_v14 }
  0x76   : > { %1246 = vmatprep.mubr.msk.f32.mxu0 %vm1691_vm0, %v1692_v1  ;;  %1397 = vmatpush3.bf16.msra.mxu0 %v1394_v5  ;;  %v838_v5 = vld [vmem:[#allocation5 + $0x118] sm:$0xff] }
  0x77   : > { %1399 = vmatprep.subr.bf16.mxu0 %v1398_v11 }
  0x78   : > { %1445 = vmatpush3.bf16.msra.mxu1 %v1442_v14  ;;  %v839_v14 = vld [vmem:[#allocation5 + $0x120] sm:$0xff] }
  0x79   : > { %1247 = vmatmul.mubr.msk.f32.gmra.mrb[10].mxu0 %vm329_vm2, %v515_v55  ;;  %1447 = vmatprep.subr.bf16.mxu1 %v1446_v20  ;;  %v620_v55 = vshrl.u32 %v619_v52, 7  ;;  %v1462_v24 = vpack.c.bf16 %v840_v15, %v839_v14 }
  0x7a   : > { %1401 = vmatpush3.bf16.msra.mxu0 %v1398_v11  ;;  %v1458_v11 = vpack.c.bf16 %v838_v5, %v837_v4 }
  0x7b   : > { %1403 = vmatprep.subr.bf16.mxu0 %v1402_v17  ;;  %vm623_vm4 = vcmp.ge.s32.totalorder %v620_v55, 1  ;;  %v622_v3 = vadd.s32 16, %v620_v55 }
  0x7c   : > { %1449 = vmatpush3.bf16.msra.mxu1 %v1446_v20  ;;  %v1078_v62 = vsel %vm623_vm4, 1.0, %v1692_v1 }
  0x7d   : > { %1451 = vmatprep.subr.bf16.mxu1 %v1450_v26  ;;  %vm628_vm5 = vcmp.le.s32.totalorder %v622_v3, 16 }
  0x7e   : > { %1405 = vmatpush3.bf16.msra.mxu0 %v1402_v17  ;;  %v1079_v20 = vsel %vm628_vm5, 1.0, %v1692_v1  ;;  %v844_v1 = vld [vmem:[#allocation5 + $0x148] sm:$0xff] }
  0x7f   : > { %1407 = vmatprep.subr.bf16.mxu0 %v1406_v23  ;;  %v1470_v34 = vpack.c.bf16 %v844_v1, %v843_v31 }
  0x80   : > { %1453 = vmatpush3.bf16.msra.mxu1 %v1450_v26  ;;  %v842_v26 = vld [vmem:[#allocation5 + $0x138] sm:$0xff] }
  0x81   : > { %1455 = vmatprep.subr.bf16.mxu1 %v1454_v32  ;;  %v1466_v30 = vpack.c.bf16 %v842_v26, %v841_v25 }
  0x82   : > { %1409 = vmatpush3.bf16.msra.mxu0 %v1406_v23 }
  0x83   : > { %1411 = vmatprep.subr.bf16.mxu0 %v1410_v29 }
  0x86   : > { %1413 = vmatpush3.bf16.msra.mxu0 %v1410_v29 }
  0x87   : > { %1415 = vmatprep.subr.bf16.mxu0 %v1414_v35 }
  0x8a   : > { %1417 = vmatpush3.bf16.msra.mxu0 %v1414_v35  ;;  %v845_v35 = vld [vmem:[#allocation5 + $0x150] sm:$0xff] }
  0x8b   : > { %1419 = vmatprep.subr.bf16.mxu0 %v1418_v38  ;;  %v1474_v37 = vpack.c.bf16 %v846_v36, %v845_v35 }
  0x8e   : > { %1421 = vmatpush3.bf16.msra.mxu0 %v1418_v38  ;;  %v847_v38 = vld [vmem:[#allocation5 + $0x160] sm:$0xff] }
 0x134   : > { %v402_v39 = vpop.f32.mrb[0].mxu0 }
 0x135   : > { %v1192_v40 = vpop.f32.mrb[1].mxu0  ;;  %v488_v41 = vpop.f32.mrb[0].mxu1 }
 0x136   : > { %v489_v42 = vadd.f32 %v488_v41, %v402_v39  ;;  %v1217_v43 = vpop.f32.mrb[1].mxu1  ;;  %v848_v39 = vld [vmem:[#allocation5 + $0x168] sm:$0xff]  ;;  %v849_v41 = vld [vmem:[#allocation5 + $0x170] sm:$0xff] }
 0x137   : > { %v1478_v40 = vpack.c.bf16 %v848_v39, %v847_v38 }
 0x138   : > { %v407_v44 = vpop.f32.mrb[2].mxu0 }
 0x139   : > { %v1195_v45 = vpop.f32.mrb[3].mxu0  ;;  %v493_v46 = vpop.f32.mrb[2].mxu1 }
 0x13a   : > { %v494_v47 = vadd.f32 %v493_v46, %v407_v44  ;;  %v1220_v48 = vpop.f32.mrb[3].mxu1 }
 0x13c   : > { %v412_v49 = vpop.f32.mrb[4].mxu0 }
 0x13d   : > { %v1198_v50 = vpop.f32.mrb[5].mxu0  ;;  %v498_v51 = vpop.f32.mrb[4].mxu1 }
 0x13e   : > { %v499_v53 = vadd.f32 %v498_v51, %v412_v49  ;;  %v1223_v54 = vpop.f32.mrb[5].mxu1 }
 0x144   : > { %v589_v56 = vpop.f32.mrb[6].mxu0 }
 0x145   : > { %v603_v58 = vadd.f32 %v589_v56, %v489_v42  ;;  %v1242_v59 = vpop.f32.mrb[7].mxu0  ;;  %v850_v42 = vld [vmem:[#allocation5 + $0x178] sm:$0xff] }
 0x146   : > { %v1482_v43 = vpack.c.bf16 %v850_v42, %v849_v41 }
 0x147   : > { %v613_v60 = vadd.f32 %v1077_v57, %v603_v58 }
 0x148   : > { %v594_v61 = vpop.f32.mrb[8].mxu0 }
 0x149   : > { %v616_v63 = vmax.f32 %v613_v60, 0.0  ;;  %v604_v0 = vadd.f32 %v594_v61, %v494_v47  ;;  %v1245_v2 = vpop.f32.mrb[9].mxu0  ;;  %v1080_v47 = vld [vmem:[%s1975_s4] ss:$0 sm:$0xff] }
 0x14b   : > { %v614_v6 = vadd.f32 %v1077_v57, %v604_v0  ;;  %v638_v7 = vmul.f32 %v1078_v62, %v616_v63 }
 0x14c   : > { %v599_v8 = vpop.f32.mrb[10].mxu0 }
 0x14d   : > { %v617_v9 = vmax.f32 %v614_v6, 0.0  ;;  %v605_v10 = vadd.f32 %v599_v8, %v499_v53  ;;  %1316 = vmatprep.mubr.f32.mxu1 %v638_v7  ;;  %v1248_v12 = vpop.f32.mrb[11].mxu0  ;;  %v677_v13 = vrot.slane %v638_v7, 1  ;;  %v851_v18 = vrot.slane %v638_v7, 2 }
 0x14f   : > { %v615_v16 = vadd.f32 %v1077_v57, %v605_v10  ;;  %1317 = vmatmul.mubr.f32.vlgmr.msra.gmra.mrb[6].mxu1 %v617_v9  ;;  %v678_v17 = vrot.slane %v617_v9, 1  ;;  %v852_v19 = vrot.slane %v617_v9, 2 }
 0x150   : > { %1457 = vmatpush3.bf16.msra.mxu1 %v1454_v32 }
 0x151   : > { %v618_v21 = vmax.f32 %v615_v16, 0.0  ;;  %v679_v22 = vsel %vm323_vm1, %v677_v13, %v678_v17  ;;  %1459 = vmatprep.subr.bf16.mxu1 %v1458_v11  ;;  %v853_v23 = vsel %vm511_vm3, %v851_v18, %v852_v19 }
 0x152   : > { %1281 = vmatprep.mubr.f32.mxu0 %v679_v22  ;;  %1351 = vmatprep.mubr.f32.mxu1 %v853_v23 }
 0x153   : > { %v640_v27 = vmul.f32 %v1079_v20, %v618_v21 }
 0x154   : > { %1461 = vmatpush3.bf16.msra.mxu1 %v1458_v11 }
 0x155   : > { %v680_v28 = vrot.slane %v640_v27, 1  ;;  %v854_v29 = vrot.slane %v640_v27, 2  ;;  %1463 = vmatprep.subr.bf16.mxu1 %v1462_v24 }
 0x157   : > { %v681_v32 = vsel %vm323_vm1, %v678_v17, %v680_v28  ;;  %v855_v33 = vsel %vm511_vm3, %v852_v19, %v854_v29 }
 0x158   : > { %1465 = vmatpush3.bf16.msra.mxu1 %v1462_v24  ;;  %1282 = vmatmul.mubr.f32.vlgmr.msra.gmra.mrb[12].mxu0 %v681_v32 }
 0x159   : > { %1467 = vmatprep.subr.bf16.mxu1 %v1466_v30 }
 0x15c   : > { %1469 = vmatpush3.bf16.msra.mxu1 %v1466_v30 }
 0x15d   : > { %1471 = vmatprep.subr.bf16.mxu1 %v1470_v34 }
 0x160   : > { %1473 = vmatpush3.bf16.msra.mxu1 %v1470_v34 }
 0x161   : > { %1475 = vmatprep.subr.bf16.mxu1 %v1474_v37 }
 0x164   : > { %1477 = vmatpush3.bf16.msra.mxu1 %v1474_v37 }
 0x165   : > { %1479 = vmatprep.subr.bf16.mxu1 %v1478_v40 }
 0x168   : > { %1481 = vmatpush3.bf16.msra.mxu1 %v1478_v40 }
 0x169   : > { %1483 = vmatprep.subr.bf16.mxu1 %v1482_v43 }
 0x16c   : > { %1485 = vmatpush3.bf16.msra.mxu1 %v1482_v43 }
 0x16f   : > { %1352 = vmatmul.mubr.f32.vlgmr.msra.gmra.mrb[6].mxu1 %v855_v33 }
 0x22b   : > { %v1283_v44 = vpop.f32.mrb[12].mxu0 }
 0x22c   : > { %v750_v45 = vpop.f32.mrb[13].mxu0 }
 0x242   : > { %v1353_v46 = vpop.f32.mrb[6].mxu1 }
 0x243   : > { %v1486_v48 = vadd.f32 %v1353_v46, %v1283_v44  ;;  %v924_v49 = vpop.f32.mrb[7].mxu1 }
 0x244   : > { %v1487_v50 = vadd.f32 %v924_v49, %v750_v45 }
 0x245   : > { %v943_v51 = vadd.f32 %v1486_v48, %v1080_v47 }
 0x246   : > { %v942_v52 = vadd.f32 %v1487_v50, %v1080_v47 }
 0x247   : > { %v945_v53 = vmax.f32 %v943_v51, 0.0 }
 0x248   : > { %v944_v54 = vmax.f32 %v942_v52, 0.0 }
 0x249   : > { %947 = vst [vmem:[%s289_s19 + $0x8] sm:$0xff] %v945_v53 }
 0x24a   : > { %946 = vst [vmem:[%s289_s19] sm:$0xff] %v944_v54 }
 0x24b   : > { %1627 = shalt.err (!%p1624_p11)
}
 0x24c   : > { %s1628_s12 = scalar_lea.hbm %s1928_s8, 256  ;;  %s1632_s16 = scalar_lea.hbm %s1977_s6, 512 }
 0x24d   : > { %p1629_p13 = scmp.ne.s32.totalorder %s1928_s8, %s1628_s12  ;;  %p1633_p6 = scmp.lt.u32.totalorder %s1928_s8, %s1977_s6 }
 0x24e   : > { %p1634_p9 = scmp.lt.u32.totalorder %s1632_s16, %s1628_s12  ;;  %p1636_p12 = scmp.lt.u32.totalorder %s1628_s12, %s1928_s8 }
 0x24f   : > { %p1630_p5 = pnand %p1629_p13, %p1990_p1 }
 0x250   : > { %p1635_p10 = por %p1634_p9, %p1633_p6 }
 0x251   : > { %p1631_p0 = pneg %p1630_p5 }
 0x252   : > { %p1637_p2 = por %p1636_p12, %p1635_p10 }
 0x254   : > { %p1638_p3 = pnand %p1637_p2, %p1631_p0 }
 0x256   : > { %1641 = shalt.err (!%p1638_p3)
}
 0x257   : > { %s1694_s19 = smov 128   ;;  %s1695_s10 = smov 8  }
 0x258   : > { %1499 = dma.vmem_to_hbm [thread:$0]  (%p1990_p1), %s1923_s20, 256, %s1928_s8, %s1930_s11, %s1694_s19, %s1694_s19, %s1695_s10  }
 0x259 PF: > { %p1516_p4 = scmp.ge.s32.totalorder %s1684_s24, 2  ;;  %s977_s25 = sand.u32 1, %s1672_s21  }
 0x25a   : > { %p1991_p7 = scmp.ne.s32.totalorder %s1982_s7, 0  ;;  %s978_s9 = scalar_lea.sflag [#allocation4], %s977_s25 }
 0x25c   : > { %p1509_p8 = pnand %p1516_p4, %p1991_p7 }
 0x25e   : > { %1667 = dma.done.wait (!%p1509_p8), %s978_s9, 256  }
 0x25f   : > { %1669 = vsyncadd (!%p1509_p8), %s978_s9, 4294967040  ;;  %p18_p11 = scmp.ge.s32.totalorder %s1756_s26, 4   ;;  %s1992_s21 = smov %s1676_s22 }
 0x260   : > { %s1993_s22 = smov %s1680_s23  ;;  %s1994_s23 = smov %s1767_s29 }
 0x261   : > { %s1995_s24 = smov %s1756_s26  ;;  %20 = sbr.rel (!%p18_p11) target bundleno = 5 (0x5), region = 95 }
 0x268   :  { %983 = vsyncpa [#allocation3], 1 }
 0x269   :  { %985 = vsyncpa [#allocation3 + $0x1], 1 }
 0x26a   :  { %986 = vsyncpa [#allocation6], 1 }
 0x26b   :  { %987 = vsyncpa [#allocation4], 1 }
 0x26c   :  { %989 = vsyncpa [#allocation4 + $0x1], 1 }

</bundles_post_ra>
